<compile_context>
chip_gen: v7x
topology: tpu7x:2x2x1
jax: 0.10.0
libtpu: 0.0.40
codegen_flags: <defaults>
</compile_context>

<pallas_src>
import functools

import jax
import jax.numpy as jnp
from jax import lax
from jax.experimental import pallas as pl
from jax.experimental.pallas import tpu as pltpu


def _vmem_limit_bytes():
    # Generation-aware scoped-VMEM budget (v5e/v6e: 128 MiB phys, v7x: 64 MiB).
    try:
        cap = pltpu.get_tpu_info().vmem_capacity_bytes
        return max(32 * 1024 * 1024, min(int(cap) * 3 // 4, 96 * 1024 * 1024))
    except Exception:
        return 32 * 1024 * 1024


VMEM_LIMIT = _vmem_limit_bytes()


# ----------------------------------------------------------------------------
# small helpers
# ----------------------------------------------------------------------------
def _round_up(n, m):
    return ((n + m - 1) // m) * m


def _row_tile(n, target):
    # row tile: multiple of 8 sublanes, never larger than needed
    return min(target, _round_up(max(n, 1), 8))


def _pad_rows(x, n):
    pad = n - x.shape[0]
    if pad == 0:
        return x
    return jnp.pad(x, ((0, pad),) + ((0, 0),) * (x.ndim - 1))


def _pad_last(w, b, opad):
    d_out = w.shape[-1]
    if d_out == opad:
        return w, b
    wp = jnp.pad(w, ((0, 0),) * (w.ndim - 1) + ((0, opad - d_out),))
    bp = jnp.pad(b, ((0, 0),) * (b.ndim - 1) + ((0, opad - d_out),))
    return wp, bp


def _resident_spec(a):
    """Whole-array block, constant index map -> stays resident in VMEM."""
    zeros = (0,) * a.ndim
    # TODO(synk): mark resident weights single-buffered (pipeline_mode=pl.Buffered(1))
    # once verified on the target jax version; default double-buffering costs 2x VMEM.
    return pl.BlockSpec(a.shape, lambda *_: zeros)


# ----------------------------------------------------------------------------
# Pallas kernels
# ----------------------------------------------------------------------------
def _mlp4_kernel(x_ref, w1, b1, w2, b2, w3, b3, w4, b4, o_ref):
    """4-layer MLP tile: ReLU after layers 1-3, linear output.
    bf16 MXU inputs, f32 accumulation / bias / ReLU."""
    h = x_ref[...].astype(jnp.bfloat16)
    h = jnp.maximum(jnp.dot(h, w1[...], preferred_element_type=jnp.float32) + b1[...], 0.0)
    h = jnp.maximum(jnp.dot(h.astype(jnp.bfloat16), w2[...],
                            preferred_element_type=jnp.float32) + b2[...], 0.0)
    h = jnp.maximum(jnp.dot(h.astype(jnp.bfloat16), w3[...],
                            preferred_element_type=jnp.float32) + b3[...], 0.0)
    o_ref[...] = jnp.dot(h.astype(jnp.bfloat16), w4[...],
                         preferred_element_type=jnp.float32) + b4[...]


def _transi_kernel(x_ref, w1, b1, w2, b2, w3, b3, w4, b4, o_ref):
    """One ensemble member (selected by the grid's `e` axis) on one row tile."""
    h = x_ref[...].astype(jnp.bfloat16)
    h = jnp.maximum(jnp.dot(h, w1[0], preferred_element_type=jnp.float32) + b1[0], 0.0)
    h = jnp.maximum(jnp.dot(h.astype(jnp.bfloat16), w2[0],
                            preferred_element_type=jnp.float32) + b2[0], 0.0)
    h = jnp.maximum(jnp.dot(h.astype(jnp.bfloat16), w3[0],
                            preferred_element_type=jnp.float32) + b3[0], 0.0)
    o_ref[0] = jnp.dot(h.astype(jnp.bfloat16), w4[0],
                       preferred_element_type=jnp.float32) + b4[0]


def _dec_obs_kernel(con_ref, ts_ref, xi0_ref,
                    w1a, w1b, w1c, b1, w2, b2, w3, b3, w4, b4, o_ref, *, horizon):
    """dec_obs MLP without materialising the concatenated input:
    layer1(x) = con@W1a + ts@W1b + xi0@W1c + b1; con/xi0 part shared over H."""
    con = con_ref[...].astype(jnp.bfloat16)       # [TB, C]
    xi0 = xi0_ref[...].astype(jnp.bfloat16)       # [TB, obs+1]
    base = (jnp.dot(con, w1a[...], preferred_element_type=jnp.float32)
            + jnp.dot(xi0, w1c[...], preferred_element_type=jnp.float32)
            + b1[...])                            # [TB, hidden], shared across h
    # TODO(synk): fuse the H small K=embt dots into a single dot (rank-3
    # contraction / lane-packed block-diagonal) and switch to fori_loop for
    # large horizons; H is small and static here.
    for h in range(horizon):
        tsh = ts_ref[:, h, :].astype(jnp.bfloat16)                       # [TB, embt]
        z = jnp.maximum(base + jnp.dot(tsh, w1b[...],
                                       preferred_element_type=jnp.float32), 0.0)
        z = jnp.maximum(jnp.dot(z.astype(jnp.bfloat16), w2[...],
                                preferred_element_type=jnp.float32) + b2[...], 0.0)
        z = jnp.maximum(jnp.dot(z.astype(jnp.bfloat16), w3[...],
                                preferred_element_type=jnp.float32) + b3[...], 0.0)
        o_ref[:, h, :] = jnp.dot(z.astype(jnp.bfloat16), w4[...],
                                 preferred_element_type=jnp.float32) + b4[...]


def _enc_argmin_kernel(x_ref, w1, b1, w2, b2, w3, b3, w4, b4, emb_ref, e2_ref,
                       encx_ref, idx_ref, ex_scr, dmin_scr, idx_scr, *, ne_tile):
    """Encoder MLP (once per row tile) + online argmin over NE tiles.
    No [TB, NE] temporary: intermediates are bounded by [TB, ne_tile]."""
    j = pl.program_id(1)

    @pl.when(j == 0)
    def _():
        h = x_ref[...].astype(jnp.bfloat16)
        h = jnp.maximum(jnp.dot(h, w1[...], preferred_element_type=jnp.float32) + b1[...], 0.0)
        h = jnp.maximum(jnp.dot(h.astype(jnp.bfloat16), w2[...],
                                preferred_element_type=jnp.float32) + b2[...], 0.0)
        h = jnp.maximum(jnp.dot(h.astype(jnp.bfloat16), w3[...],
                                preferred_element_type=jnp.float32) + b3[...], 0.0)
        enc_x = jnp.dot(h.astype(jnp.bfloat16), w4[...],
                        preferred_element_type=jnp.float32) + b4[...]     # [TB, Cpad] f32
        ex_scr[...] = enc_x
        encx_ref[...] = enc_x
        dmin_scr[...] = jnp.full_like(dmin_scr, jnp.inf)
        idx_scr[...] = jnp.zeros_like(idx_scr)

    # distance up to the row-constant ||x||^2 term (argmin invariant), f32.
    # TODO(synk): optionally run this matmul in bf16 (3x MXU rate) accepting
    # slightly perturbed tie-breaks.
    enc_x = ex_scr[...]                                                   # [TB, Cpad]
    e = emb_ref[...]                                                      # [NT, Cpad]
    xe = lax.dot_general(enc_x, e, (((1,), (1,)), ((), ())),
                         preferred_element_type=jnp.float32)              # [TB, NT]
    d = e2_ref[...] - 2.0 * xe                                            # [TB, NT]

    lane = j * ne_tile + lax.broadcasted_iota(jnp.int32, d.shape, 1)
    tmin = jnp.min(d, axis=1, keepdims=True)
    tidx = jnp.min(jnp.where(d <= tmin, lane, jnp.int32(2 ** 30)),
                   axis=1, keepdims=True)                                 # first-min in tile
    better = tmin < dmin_scr[...]                                         # strict: keep earlier tile on ties
    idx_scr[...] = jnp.where(better, tidx, idx_scr[...])
    dmin_scr[...] = jnp.where(better, tmin, dmin_scr[...])

    @pl.when(j == pl.num_programs(1) - 1)
    def _():
        idx_ref[...] = idx_scr[...]


def _vq_stats_kernel(encx_ref, idx_ref, cs_ref, dwt_ref, *, batch, ne_tile):
    """EMA statistics for one NE tile, accumulated over row tiles.
    cs[k] = #rows assigned to code k; dw^T[:, k] = sum of enc_x rows assigned to k.
    The one-hot never leaves VMEM and dw uses M = Cpad (not NE) on the MXU."""
    j = pl.program_id(0)      # NE tile (parallel)
    i = pl.program_id(1)      # row tile (reduction)
    tb = encx_ref.shape[0]

    @pl.when(i == 0)
    def _():
        cs_ref[...] = jnp.zeros_like(cs_ref)
        dwt_ref[...] = jnp.zeros_like(dwt_ref)

    lane = j * ne_tile + lax.broadcasted_iota(jnp.int32, (tb, ne_tile), 1)
    row = i * tb + lax.broadcasted_iota(jnp.int32, (tb, 1), 0)
    onehot = ((lane == idx_ref[...]) & (row < batch)).astype(jnp.float32)  # [TB, NT]

    cs_ref[...] += jnp.sum(onehot, axis=0, keepdims=True)                  # [1, NT]
    dwt_ref[...] += lax.dot_general(encx_ref[...], onehot,
                                    (((0,), (0,)), ((), ())),
                                    preferred_element_type=jnp.float32)    # [Cpad, NT]


# ----------------------------------------------------------------------------
# Wrappers (grid over rows, weights resident, lane-dense padded outputs)
# ----------------------------------------------------------------------------
def mlp4(x, params, *, row_tile=512):
    (w1, b1), (w2, b2), (w3, b3), (w4, b4) = params
    n, d_in = x.shape
    d_out = w4.shape[1]
    opad = _round_up(max(d_out, 128), 128)
    w4p, b4p = _pad_last(w4, b4, opad)
    tn = _row_tile(n, row_tile)
    n_pad = _round_up(n, tn)
    xp = _pad_rows(x, n_pad)
    consts = (w1, b1, w2, b2, w3, b3, w4p, b4p)
    out = pl.pallas_call(
        _mlp4_kernel,
        out_shape=jax.ShapeDtypeStruct((n_pad, opad), jnp.float32),
        grid=(n_pad // tn,),
        in_specs=[pl.BlockSpec((tn, d_in), lambda i: (i, 0))]
        + [_resident_spec(a) for a in consts],
        out_specs=pl.BlockSpec((tn, opad), lambda i: (i, 0)),
        compiler_params=pltpu.CompilerParams(
            dimension_semantics=("parallel",), vmem_limit_bytes=VMEM_LIMIT),
    )(xp, *consts)
    return out[:n, :d_out]


def transi_ensemble(x, stacked, *, row_tile=512):
    """Ensemble as a grid axis: one member's weights resident at a time."""
    (w1, b1), (w2, b2), (w3, b3), (w4, b4) = stacked
    ens, d_in, _ = w1.shape
    d_out = w4.shape[-1]
    opad = _round_up(max(d_out, 128), 128)
    w4p, b4p = _pad_last(w4, b4, opad)
    n = x.shape[0]
    tn = _row_tile(n, row_tile)
    n_pad = _round_up(n, tn)
    xp = _pad_rows(x, n_pad)
    consts = (w1, b1, w2, b2, w3, b3, w4p, b4p)
    weight_specs = [pl.BlockSpec((1,) + a.shape[1:], lambda e, i: (e, 0, 0))
                    for a in consts]
    out = pl.pallas_call(
        _transi_kernel,
        out_shape=jax.ShapeDtypeStruct((ens, n_pad, opad), jnp.float32),
        grid=(ens, n_pad // tn),
        in_specs=[pl.BlockSpec((tn, d_in), lambda e, i: (i, 0))] + weight_specs,
        out_specs=pl.BlockSpec((1, tn, opad), lambda e, i: (e, i, 0)),
        compiler_params=pltpu.CompilerParams(
            dimension_semantics=("arbitrary", "parallel"),
            vmem_limit_bytes=VMEM_LIMIT),
    )(xp, *consts)
    return out[:, :n, :d_out]


def dec_obs_mlp(con, ts, xi0, params, *, row_tile=256):
    (w1, b1), (w2, b2), (w3, b3), (w4, b4) = params
    b, c = con.shape
    _, horizon, embt = ts.shape
    d_xi0 = xi0.shape[1]
    d_out = w4.shape[1]
    opad = _round_up(max(d_out, 128), 128)
    w4p, b4p = _pad_last(w4, b4, opad)
    # split layer-1 weight row-wise: rows for [con | ts | xi0] segments
    w1a, w1b, w1c = w1[:c], w1[c:c + embt], w1[c + embt:]
    tb = _row_tile(b, row_tile)
    b_pad = _round_up(b, tb)
    conp = _pad_rows(con, b_pad)
    tsp = _pad_rows(ts, b_pad)
    xi0p = _pad_rows(xi0, b_pad)
    consts = (w1a, w1b, w1c, b1, w2, b2, w3, b3, w4p, b4p)
    out = pl.pallas_call(
        functools.partial(_dec_obs_kernel, horizon=horizon),
        out_shape=jax.ShapeDtypeStruct((b_pad, horizon, opad), jnp.float32),
        grid=(b_pad // tb,),
        in_specs=[pl.BlockSpec((tb, c), lambda i: (i, 0)),
                  pl.BlockSpec((tb, horizon, embt), lambda i: (i, 0, 0)),
                  pl.BlockSpec((tb, d_xi0), lambda i: (i, 0))]
        + [_resident_spec(a) for a in consts],
        out_specs=pl.BlockSpec((tb, horizon, opad), lambda i: (i, 0, 0)),
        compiler_params=pltpu.CompilerParams(
            dimension_semantics=("parallel",), vmem_limit_bytes=VMEM_LIMIT),
    )(conp, tsp, xi0p, *consts)
    return out[:b, :, :d_out]


def enc_vq(x, enc_params, embeddings, *, row_tile=256, ne_tile=512):
    """Encoder MLP + VQ nearest-codeword + EMA statistics (NE-tiled).
    Returns enc_x, quantized, idx, cluster_size, dw."""
    (w1, b1), (w2, b2), (w3, b3), (w4, b4) = enc_params
    b, d_in = x.shape
    ne, c = embeddings.shape
    cpad = _round_up(max(c, 128), 128)
    w4p, b4p = _pad_last(w4, b4, cpad)

    tb = _row_tile(b, row_tile)
    b_pad = _round_up(b, tb)
    xp = _pad_rows(x, b_pad)

    nt = min(ne_tile, _round_up(ne, 128))
    ne_pad = _round_up(ne, nt)
    emb_p = jnp.pad(embeddings, ((0, ne_pad - ne), (0, cpad - c)))        # [NE_pad, Cpad]
    e2 = jnp.sum(embeddings * embeddings, axis=1)                          # hoisted ||e_j||^2
    e2_p = jnp.pad(e2, (0, ne_pad - ne), constant_values=1e30)[None, :]    # pad never wins argmin

    consts = (w1, b1, w2, b2, w3, b3, w4p, b4p)

    # ---- kernel A: encoder MLP + online argmin over NE tiles ----
    encx_p, idx_p = pl.pallas_call(
        functools.partial(_enc_argmin_kernel, ne_tile=nt),
        out_shape=(jax.ShapeDtypeStruct((b_pad, cpad), jnp.float32),
                   jax.ShapeDtypeStruct((b_pad, 1), jnp.int32)),
        grid=(b_pad // tb, ne_pad // nt),
        in_specs=[pl.BlockSpec((tb, d_in), lambda i, j: (i, 0))]
        + [_resident_spec(a) for a in consts]
        + [pl.BlockSpec((nt, cpad), lambda i, j: (j, 0)),
           pl.BlockSpec((1, nt), lambda i, j: (0, j))],
        out_specs=(pl.BlockSpec((tb, cpad), lambda i, j: (i, 0)),
                   pl.BlockSpec((tb, 1), lambda i, j: (i, 0))),
        scratch_shapes=[pltpu.VMEM((tb, cpad), jnp.float32),
                        pltpu.VMEM((tb, 1), jnp.float32),
                        pltpu.VMEM((tb, 1), jnp.int32)],
        compiler_params=pltpu.CompilerParams(
            dimension_semantics=("parallel", "arbitrary"),
            vmem_limit_bytes=VMEM_LIMIT),
    )(xp, *consts, emb_p, e2_p)

    # ---- kernel B: EMA statistics, NE tiles parallel, row tiles reduced ----
    cs_p, dwt_p = pl.pallas_call(
        functools.partial(_vq_stats_kernel, batch=b, ne_tile=nt),
        out_shape=(jax.ShapeDtypeStruct((1, ne_pad), jnp.float32),
                   jax.ShapeDtypeStruct((cpad, ne_pad), jnp.float32)),
        grid=(ne_pad // nt, b_pad // tb),
        in_specs=[pl.BlockSpec((tb, cpad), lambda j, i: (i, 0)),
                  pl.BlockSpec((tb, 1), lambda j, i: (i, 0))],
        out_specs=(pl.BlockSpec((1, nt), lambda j, i: (0, j)),
                   pl.BlockSpec((cpad, nt), lambda j, i: (0, j))),
        compiler_params=pltpu.CompilerParams(
            dimension_semantics=("parallel", "arbitrary"),
            vmem_limit_bytes=VMEM_LIMIT),
    )(encx_p, idx_p)

    enc_x = encx_p[:b, :c]
    idx = idx_p[:b]
    quantized = jnp.take(embeddings, idx[:, 0], axis=0)    # replaces the one-hot matmul
    cluster_size = cs_p[0, :ne]
    dw = dwt_p[:c, :ne].T                                   # back to [NE, C]
    return enc_x, quantized, idx, cluster_size, dw


# ----------------------------------------------------------------------------
# Parameter setup (weights stored [D_in, D_out] bf16; biases [1, D_out] f32)
# ----------------------------------------------------------------------------
def _linear_init(key, d_in, d_out):
    kw, kb = jax.random.split(key)
    bound = 1.0 / jnp.sqrt(jnp.float32(d_in))
    w = jax.random.uniform(kw, (d_in, d_out), jnp.float32, -bound, bound)
    b = jax.random.uniform(kb, (1, d_out), jnp.float32, -bound, bound)
    return w.astype(jnp.bfloat16), b


def _mlp4_init(key, dims):
    keys = jax.random.split(key, 4)
    return tuple(_linear_init(k, dims[i], dims[i + 1]) for i, k in enumerate(keys))


def _mlp4_stack_init(key, dims, ens):
    members = [_mlp4_init(k, dims) for k in jax.random.split(key, ens)]
    stacked = []
    for layer in range(4):
        w = jnp.stack([m[layer][0] for m in members])      # [E, D_in, D_out] bf16
        b = jnp.stack([m[layer][1] for m in members])      # [E, 1, D_out]   f32
        stacked.append((w, b))
    return tuple(stacked)


def make_params(key, *, horizon, obs_dim, act_dim, context_dim,
                embt_dim=5, num_embeddings=4096, hidden=512, ensemble_num=1):
    ne = num_embeddings * (horizon - 1)
    keys = jax.random.split(key, 6)
    params = {
        "enc": _mlp4_init(keys[0], (horizon * (obs_dim + 1), hidden, hidden, hidden, context_dim)),
        "dec_obs": _mlp4_init(keys[1], (context_dim + embt_dim + obs_dim + 1,
                                        hidden, hidden, hidden, obs_dim + 1)),
        "act": _mlp4_init(keys[2], (obs_dim * 2, hidden, hidden, hidden, act_dim)),
        "transi": _mlp4_stack_init(
            keys[5], (obs_dim + act_dim + 1, hidden, hidden, hidden, obs_dim + 1), ensemble_num),
        # nn.Embedding(horizon+1, embt_dim): default init N(0, 1)
        "dec_t": jax.random.normal(keys[3], (horizon + 1, embt_dim), jnp.float32),
        # codebook: xavier_uniform, kept in f32 for exact distance computation
        "embeddings": jax.random.uniform(
            keys[4], (ne, context_dim), jnp.float32,
            -jnp.sqrt(6.0 / (ne + context_dim)), jnp.sqrt(6.0 / (ne + context_dim))),
    }
    buffers = {
        "ema_dw_hidden": jnp.zeros((ne, context_dim), jnp.float32),
        "ema_dw_counter": 0,
        "ema_cs_hidden": jnp.zeros((ne,), jnp.float32),
        "ema_cs_counter": 0,
    }
    cfg = dict(horizon=horizon, obs_dim=obs_dim, act_dim=act_dim, context_dim=context_dim,
               embt_dim=embt_dim, num_embeddings=ne, hidden=hidden,
               ensemble_num=ensemble_num, decay=0.99, epsilon=1e-5)
    return params, buffers, cfg


# ----------------------------------------------------------------------------
# Forward pass (semantics of TrajEncoder.forward with all branch flags True)
# ----------------------------------------------------------------------------
def traj_encoder_forward(params, buffers, cfg, inputx, inputts,
                         conp=True, obsp=True, actp=True, transip=True):
    H = cfg["horizon"]
    obs_dim = cfg["obs_dim"]
    NE = cfg["num_embeddings"]
    decay = cfg["decay"]
    eps = cfg["epsilon"]
    B = inputx.shape[0]

    con, loss, enc_x = None, jnp.float32(0.0), None
    new_buffers = dict(buffers)
    new_embeddings = params["embeddings"]
    xpt = None

    if conp:
        # inputx[:, :, [0..obs_dim-1, -1]]
        xpt = jnp.concatenate([inputx[:, :, :obs_dim], inputx[:, :, -1:]], axis=-1)  # [B,H,obs+1]
        x = xpt.reshape(B, H * (obs_dim + 1))

        enc_x, quantized, _, cluster_size, dw = enc_vq(x, params["enc"], params["embeddings"])

        # --- EMA codebook update (buffer mutation in torch; small pure-JAX glue here,
        #     all heavy [B, NE] work already reduced inside the kernels) ---
        cs_counter = buffers["ema_cs_counter"] + 1
        cs_hidden = buffers["ema_cs_hidden"] - (buffers["ema_cs_hidden"] - cluster_size) * (1 - decay)
        ema_cs = cs_hidden / (1 - decay ** cs_counter)
        n = jnp.sum(ema_cs)
        ema_cs = (ema_cs + eps) / (n + NE * eps) * n

        dw_counter = buffers["ema_dw_counter"] + 1
        dw_hidden = buffers["ema_dw_hidden"] - (buffers["ema_dw_hidden"] - dw) * (1 - decay)
        ema_dw = dw_hidden / (1 - decay ** dw_counter)
        new_embeddings = ema_dw / ema_cs[:, None]

        new_buffers.update(ema_cs_counter=cs_counter, ema_cs_hidden=cs_hidden,
                           ema_dw_counter=dw_counter, ema_dw_hidden=dw_hidden)

        loss = jnp.mean((enc_x - lax.stop_gradient(quantized)) ** 2)
        con = enc_x + lax.stop_gradient(quantized - enc_x)

    obs = None
    if obsp:
        assert conp
        t_idx = jnp.maximum(inputts - inputts[:, :1] + 1, 0)              # [B,H] int
        ts = jnp.take(params["dec_t"], t_idx, axis=0)                     # [B,H,embt]
        xi0 = xpt[:, 0, :]                                                # [B,obs+1]
        obs = dec_obs_mlp(con, ts, xi0, params["dec_obs"])                # [B,H,obs+1]

    act = None
    if actp:
        act_x = jnp.concatenate([inputx[:, :-1, :obs_dim], inputx[:, 1:, :obs_dim]], axis=-1)
        out = mlp4(act_x.reshape(B * (H - 1), 2 * obs_dim), params["act"])
        act = out.reshape(B, H - 1, cfg["act_dim"])

    transiss = []
    if transip:
        flat = inputx.reshape(B * H, inputx.shape[-1])
        outs = transi_ensemble(flat, params["transi"])                    # [E, B*H, obs+1]
        transiss = [outs[e].reshape(B, H, obs_dim + 1) for e in range(cfg["ensemble_num"])]

    return (con, loss, obs, act, transiss, enc_x), new_buffers, new_embeddings


# ----------------------------------------------------------------------------
if __name__ == "__main__":
    # small config: horizon=4, obs_dim=6, act_dim=3 -> transition_dim=10,
    # context_dim=8, hidden=32, num_embeddings=16*(4-1)=48
    key = jax.random.PRNGKey(0)
    kparam, kx = jax.random.split(key)
    params, buffers, cfg = make_params(
        kparam, horizon=4, obs_dim=6, act_dim=3, context_dim=8,
        embt_dim=5, num_embeddings=16, hidden=32, ensemble_num=1)

    B, H, T = 2, cfg["horizon"], cfg["obs_dim"] + cfg["act_dim"] + 1
    inputx = jax.random.normal(kx, (B, H, T), jnp.float32)
    inputts = jnp.array([[3, 4, 5, 6], [0, 1, 2, 3]], dtype=jnp.int32)

    (con, loss, obs, act, transiss, enc_x), new_buffers, new_emb = traj_encoder_forward(
        params, buffers, cfg, inputx, inputts,
        conp=True, obsp=True, actp=True, transip=True)

    jax.block_until_ready((con, loss, obs, act, transiss, enc_x, new_emb))

    assert con.shape == (B, cfg["context_dim"])
    assert enc_x.shape == (B, cfg["context_dim"])
    assert obs.shape == (B, H, cfg["obs_dim"] + 1)
    assert act.shape == (B, H - 1, cfg["act_dim"])
    assert len(transiss) == 1 and transiss[0].shape == (B, H, cfg["obs_dim"] + 1)
    assert new_emb.shape == (cfg["num_embeddings"], cfg["context_dim"])
    print("KERNEL_OK")
</pallas_src>

<mosaic_0001>
module attributes {stable_mosaic.version = 11 : i64} {
  func.func @_enc_argmin_kernel(%arg0: i32, %arg1: i32, %arg2: memref<8x28xf32, #tpu.memory_space<vmem>>, %arg3: memref<28x32xbf16, #tpu.memory_space<vmem>>, %arg4: memref<1x32xf32, #tpu.memory_space<vmem>>, %arg5: memref<32x32xbf16, #tpu.memory_space<vmem>>, %arg6: memref<1x32xf32, #tpu.memory_space<vmem>>, %arg7: memref<32x32xbf16, #tpu.memory_space<vmem>>, %arg8: memref<1x32xf32, #tpu.memory_space<vmem>>, %arg9: memref<32x128xbf16, #tpu.memory_space<vmem>>, %arg10: memref<1x128xf32, #tpu.memory_space<vmem>>, %arg11: memref<128x128xf32, #tpu.memory_space<vmem>>, %arg12: memref<1x128xf32, #tpu.memory_space<vmem>>, %arg13: memref<8x128xf32, #tpu.memory_space<vmem>>, %arg14: memref<8x1xi32, #tpu.memory_space<vmem>>, %arg15: memref<8x128xf32, #tpu.memory_space<vmem>>, %arg16: memref<8x1xf32, #tpu.memory_space<vmem>>, %arg17: memref<8x1xi32, #tpu.memory_space<vmem>>) attributes {dimension_semantics = [#tpu.dimension_semantics<parallel>, #tpu.dimension_semantics<arbitrary>], iteration_bounds = array<i64: 1, 1>, scalar_prefetch = 0 : i64, scratch_operands = 3 : i64, tpu.core_type = #tpu.core_type<tc>, window_params = [{transform_indices = @transform_0, window_bounds = array<i64: 8, 28>}, {pipeline_mode = #tpu.pipeline_mode<synchronous>, transform_indices = @transform_1, window_bounds = array<i64: 28, 32>}, {pipeline_mode = #tpu.pipeline_mode<synchronous>, transform_indices = @transform_2, window_bounds = array<i64: 1, 32>}, {pipeline_mode = #tpu.pipeline_mode<synchronous>, transform_indices = @transform_3, window_bounds = array<i64: 32, 32>}, {pipeline_mode = #tpu.pipeline_mode<synchronous>, transform_indices = @transform_4, window_bounds = array<i64: 1, 32>}, {pipeline_mode = #tpu.pipeline_mode<synchronous>, transform_indices = @transform_5, window_bounds = array<i64: 32, 32>}, {pipeline_mode = #tpu.pipeline_mode<synchronous>, transform_indices = @transform_6, window_bounds = array<i64: 1, 32>}, {pipeline_mode = #tpu.pipeline_mode<synchronous>, transform_indices = @transform_7, window_bounds = array<i64: 32, 128>}, {pipeline_mode = #tpu.pipeline_mode<synchronous>, transform_indices = @transform_8, window_bounds = array<i64: 1, 128>}, {transform_indices = @transform_9, window_bounds = array<i64: 128, 128>}, {transform_indices = @transform_10, window_bounds = array<i64: 1, 128>}, {transform_indices = @transform_11, window_bounds = array<i64: 8, 128>}, {transform_indices = @transform_12, window_bounds = array<i64: 8, 1>}]} {
    %c0_i32 = arith.constant 0 : i32
    %0 = arith.cmpi eq, %arg1, %c0_i32 : i32
    %1 = arith.extui %0 : i1 to i32
    %c0_i32_0 = arith.constant 0 : i32
    %2 = arith.cmpi ne, %1, %c0_i32_0 : i32
    scf.if %2 {
      %c0_21 = arith.constant 0 : index
      %c0_22 = arith.constant 0 : index
      %34 = vector.load %arg2[%c0_21, %c0_22] : memref<8x28xf32, #tpu.memory_space<vmem>>, vector<8x28xf32>
      %35 = arith.truncf %34 : vector<8x28xf32> to vector<8x28xbf16>
      %c0_23 = arith.constant 0 : index
      %c0_24 = arith.constant 0 : index
      %36 = vector.load %arg3[%c0_23, %c0_24] : memref<28x32xbf16, #tpu.memory_space<vmem>>, vector<28x32xbf16>
      %cst_25 = arith.constant dense<0.000000e+00> : vector<8x32xf32>
      %37 = tpu.matmul %35, %36, %cst_25 {dimension_numbers = #tpu.dot_dimension_numbers<[1], [0], [0], [1], [0, 0, 1, 1], [], []>} : vector<8x28xbf16>, vector<28x32xbf16>, vector<8x32xf32> -> vector<8x32xf32>
      %c0_26 = arith.constant 0 : index
      %c0_27 = arith.constant 0 : index
      %38 = vector.load %arg4[%c0_26, %c0_27] : memref<1x32xf32, #tpu.memory_space<vmem>>, vector<1x32xf32>
      %39 = vector.broadcast %38 : vector<1x32xf32> to vector<8x32xf32>
      %40 = arith.addf %37, %39 : vector<8x32xf32>
      %cst_28 = arith.constant 0.000000e+00 : f32
      %41 = vector.broadcast %cst_28 : f32 to vector<8x32xf32>
      %42 = arith.maximumf %40, %41 : vector<8x32xf32>
      %43 = arith.truncf %42 : vector<8x32xf32> to vector<8x32xbf16>
      %c0_29 = arith.constant 0 : index
      %c0_30 = arith.constant 0 : index
      %44 = vector.load %arg5[%c0_29, %c0_30] : memref<32x32xbf16, #tpu.memory_space<vmem>>, vector<32x32xbf16>
      %cst_31 = arith.constant dense<0.000000e+00> : vector<8x32xf32>
      %45 = tpu.matmul %43, %44, %cst_31 {dimension_numbers = #tpu.dot_dimension_numbers<[1], [0], [0], [1], [0, 0, 1, 1], [], []>} : vector<8x32xbf16>, vector<32x32xbf16>, vector<8x32xf32> -> vector<8x32xf32>
      %c0_32 = arith.constant 0 : index
      %c0_33 = arith.constant 0 : index
      %46 = vector.load %arg6[%c0_32, %c0_33] : memref<1x32xf32, #tpu.memory_space<vmem>>, vector<1x32xf32>
      %47 = vector.broadcast %46 : vector<1x32xf32> to vector<8x32xf32>
      %48 = arith.addf %45, %47 : vector<8x32xf32>
      %cst_34 = arith.constant 0.000000e+00 : f32
      %49 = vector.broadcast %cst_34 : f32 to vector<8x32xf32>
      %50 = arith.maximumf %48, %49 : vector<8x32xf32>
      %51 = arith.truncf %50 : vector<8x32xf32> to vector<8x32xbf16>
      %c0_35 = arith.constant 0 : index
      %c0_36 = arith.constant 0 : index
      %52 = vector.load %arg7[%c0_35, %c0_36] : memref<32x32xbf16, #tpu.memory_space<vmem>>, vector<32x32xbf16>
      %cst_37 = arith.constant dense<0.000000e+00> : vector<8x32xf32>
      %53 = tpu.matmul %51, %52, %cst_37 {dimension_numbers = #tpu.dot_dimension_numbers<[1], [0], [0], [1], [0, 0, 1, 1], [], []>} : vector<8x32xbf16>, vector<32x32xbf16>, vector<8x32xf32> -> vector<8x32xf32>
      %c0_38 = arith.constant 0 : index
      %c0_39 = arith.constant 0 : index
      %54 = vector.load %arg8[%c0_38, %c0_39] : memref<1x32xf32, #tpu.memory_space<vmem>>, vector<1x32xf32>
      %55 = vector.broadcast %54 : vector<1x32xf32> to vector<8x32xf32>
      %56 = arith.addf %53, %55 : vector<8x32xf32>
      %cst_40 = arith.constant 0.000000e+00 : f32
      %57 = vector.broadcast %cst_40 : f32 to vector<8x32xf32>
      %58 = arith.maximumf %56, %57 : vector<8x32xf32>
      %59 = arith.truncf %58 : vector<8x32xf32> to vector<8x32xbf16>
      %c0_41 = arith.constant 0 : index
      %c0_42 = arith.constant 0 : index
      %60 = vector.load %arg9[%c0_41, %c0_42] : memref<32x128xbf16, #tpu.memory_space<vmem>>, vector<32x128xbf16>
      %cst_43 = arith.constant dense<0.000000e+00> : vector<8x128xf32>
      %61 = tpu.matmul %59, %60, %cst_43 {dimension_numbers = #tpu.dot_dimension_numbers<[1], [0], [0], [1], [0, 0, 1, 1], [], []>} : vector<8x32xbf16>, vector<32x128xbf16>, vector<8x128xf32> -> vector<8x128xf32>
      %c0_44 = arith.constant 0 : index
      %c0_45 = arith.constant 0 : index
      %62 = vector.load %arg10[%c0_44, %c0_45] : memref<1x128xf32, #tpu.memory_space<vmem>>, vector<1x128xf32>
      %63 = vector.broadcast %62 : vector<1x128xf32> to vector<8x128xf32>
      %64 = arith.addf %61, %63 : vector<8x128xf32>
      %c0_46 = arith.constant 0 : index
      %c0_47 = arith.constant 0 : index
      %65 = vector.load %arg15[%c0_46, %c0_47] : memref<8x128xf32, #tpu.memory_space<vmem>>, vector<8x128xf32>
      tpu.vector_store %arg15[%c0_46, %c0_47], %64 {strides = array<i32>} : memref<8x128xf32, #tpu.memory_space<vmem>>, vector<8x128xf32>,
      %c0_48 = arith.constant 0 : index
      %c0_49 = arith.constant 0 : index
      %66 = vector.load %arg13[%c0_48, %c0_49] : memref<8x128xf32, #tpu.memory_space<vmem>>, vector<8x128xf32>
      tpu.vector_store %arg13[%c0_48, %c0_49], %64 {strides = array<i32>} : memref<8x128xf32, #tpu.memory_space<vmem>>, vector<8x128xf32>,
      %cst_50 = arith.constant 0x7F800000 : f32
      %67 = vector.broadcast %cst_50 : f32 to vector<8x1xf32>
      %c0_51 = arith.constant 0 : index
      %c0_52 = arith.constant 0 : index
      %68 = vector.load %arg16[%c0_51, %c0_52] : memref<8x1xf32, #tpu.memory_space<vmem>>, vector<8x1xf32>
      tpu.vector_store %arg16[%c0_51, %c0_52], %67 {strides = array<i32>} : memref<8x1xf32, #tpu.memory_space<vmem>>, vector<8x1xf32>,
      %c0_i32_53 = arith.constant 0 : i32
      %69 = vector.broadcast %c0_i32_53 : i32 to vector<8x1xi32>
      %c0_54 = arith.constant 0 : index
      %c0_55 = arith.constant 0 : index
      %70 = vector.load %arg17[%c0_54, %c0_55] : memref<8x1xi32, #tpu.memory_space<vmem>>, vector<8x1xi32>
      tpu.vector_store %arg17[%c0_54, %c0_55], %69 {strides = array<i32>} : memref<8x1xi32, #tpu.memory_space<vmem>>, vector<8x1xi32>,
    } else {
    }
    %c0 = arith.constant 0 : index
    %c0_1 = arith.constant 0 : index
    %3 = vector.load %arg15[%c0, %c0_1] : memref<8x128xf32, #tpu.memory_space<vmem>>, vector<8x128xf32>
    %c0_2 = arith.constant 0 : index
    %c0_3 = arith.constant 0 : index
    %4 = vector.load %arg11[%c0_2, %c0_3] : memref<128x128xf32, #tpu.memory_space<vmem>>, vector<128x128xf32>
    %cst = arith.constant dense<0.000000e+00> : vector<8x128xf32>
    %5 = tpu.matmul %3, %4, %cst {dimension_numbers = #tpu.dot_dimension_numbers<[1], [1], [0], [0], [0, 0, 1, 0], [], []>} : vector<8x128xf32>, vector<128x128xf32>, vector<8x128xf32> -> vector<8x128xf32>
    %c0_4 = arith.constant 0 : index
    %c0_5 = arith.constant 0 : index
    %6 = vector.load %arg12[%c0_4, %c0_5] : memref<1x128xf32, #tpu.memory_space<vmem>>, vector<1x128xf32>
    %cst_6 = arith.constant 2.000000e+00 : f32
    %7 = vector.broadcast %cst_6 : f32 to vector<8x128xf32>
    %8 = arith.mulf %7, %5 : vector<8x128xf32>
    %9 = vector.broadcast %6 : vector<1x128xf32> to vector<8x128xf32>
    %10 = arith.subf %9, %8 : vector<8x128xf32>
    %c128_i32 = arith.constant 128 : i32
    %11 = arith.muli %arg1, %c128_i32 : i32
    %12 = tpu.iota {dimensions = array<i32: 1>} : vector<8x128xi32>
    %13 = vector.broadcast %11 : i32 to vector<8x128xi32>
    %14 = arith.addi %13, %12 : vector<8x128xi32>
    %cst_7 = arith.constant dense<0x7F800000> : vector<8xf32>
    %15 = vector.multi_reduction <minimumf>, %10, %cst_7 [1] : vector<8x128xf32> to vector<8xf32>
    %16 = vector.shape_cast %15 : vector<8xf32> to vector<8x1xf32>
    %17 = vector.broadcast %16 : vector<8x1xf32> to vector<8x128xf32>
    %18 = arith.cmpf ole, %10, %17 : vector<8x128xf32>
    %c1073741824_i32 = arith.constant 1073741824 : i32
    %19 = vector.broadcast %c1073741824_i32 : i32 to vector<8x128xi32>
    %20 = arith.select %18, %14, %19 : vector<8x128xi1>, vector<8x128xi32>
    %cst_8 = arith.constant dense<2147483647> : vector<8xi32>
    %21 = vector.multi_reduction <minsi>, %20, %cst_8 [1] : vector<8x128xi32> to vector<8xi32>
    %22 = vector.shape_cast %21 : vector<8xi32> to vector<8x1xi32>
    %c0_9 = arith.constant 0 : index
    %c0_10 = arith.constant 0 : index
    %23 = vector.load %arg16[%c0_9, %c0_10] : memref<8x1xf32, #tpu.memory_space<vmem>>, vector<8x1xf32>
    %24 = arith.cmpf olt, %16, %23 : vector<8x1xf32>
    %c0_11 = arith.constant 0 : index
    %c0_12 = arith.constant 0 : index
    %25 = vector.load %arg17[%c0_11, %c0_12] : memref<8x1xi32, #tpu.memory_space<vmem>>, vector<8x1xi32>
    %26 = arith.select %24, %22, %25 : vector<8x1xi1>, vector<8x1xi32>
    %c0_13 = arith.constant 0 : index
    %c0_14 = arith.constant 0 : index
    %27 = vector.load %arg17[%c0_13, %c0_14] : memref<8x1xi32, #tpu.memory_space<vmem>>, vector<8x1xi32>
    tpu.vector_store %arg17[%c0_13, %c0_14], %26 {strides = array<i32>} : memref<8x1xi32, #tpu.memory_space<vmem>>, vector<8x1xi32>,
    %c0_15 = arith.constant 0 : index
    %c0_16 = arith.constant 0 : index
    %28 = vector.load %arg16[%c0_15, %c0_16] : memref<8x1xf32, #tpu.memory_space<vmem>>, vector<8x1xf32>
    %29 = arith.select %24, %16, %28 : vector<8x1xi1>, vector<8x1xf32>
    %c0_17 = arith.constant 0 : index
    %c0_18 = arith.constant 0 : index
    %30 = vector.load %arg16[%c0_17, %c0_18] : memref<8x1xf32, #tpu.memory_space<vmem>>, vector<8x1xf32>
    tpu.vector_store %arg16[%c0_17, %c0_18], %29 {strides = array<i32>} : memref<8x1xf32, #tpu.memory_space<vmem>>, vector<8x1xf32>,
    %c0_i32_19 = arith.constant 0 : i32
    %31 = arith.cmpi eq, %arg1, %c0_i32_19 : i32
    %32 = arith.extui %31 : i1 to i32
    %c0_i32_20 = arith.constant 0 : i32
    %33 = arith.cmpi ne, %32, %c0_i32_20 : i32
    scf.if %33 {
      %c0_21 = arith.constant 0 : index
      %c0_22 = arith.constant 0 : index
      %34 = vector.load %arg17[%c0_21, %c0_22] : memref<8x1xi32, #tpu.memory_space<vmem>>, vector<8x1xi32>
      %c0_23 = arith.constant 0 : index
      %c0_24 = arith.constant 0 : index
      %35 = vector.load %arg14[%c0_23, %c0_24] : memref<8x1xi32, #tpu.memory_space<vmem>>, vector<8x1xi32>
      tpu.vector_store %arg14[%c0_23, %c0_24], %34 {strides = array<i32>} : memref<8x1xi32, #tpu.memory_space<vmem>>, vector<8x1xi32>,
    } else {
    }
    return
  }
  func.func @transform_0(%arg0: i32, %arg1: i32) -> (i32, i32) {
    %c0_i32 = arith.constant 0 : i32
    %c0_i32_0 = arith.constant 0 : i32
    return %arg0, %c0_i32 : i32, i32
  }
  func.func @transform_1(%arg0: i32, %arg1: i32) -> (i32, i32) {
    %c0_i32 = arith.constant 0 : i32
    %c0_i32_0 = arith.constant 0 : i32
    %c0_i32_1 = arith.constant 0 : i32
    return %c0_i32, %c0_i32_0 : i32, i32
  }
  func.func @transform_2(%arg0: i32, %arg1: i32) -> (i32, i32) {
    %c0_i32 = arith.constant 0 : i32
    %c0_i32_0 = arith.constant 0 : i32
    %c0_i32_1 = arith.constant 0 : i32
    return %c0_i32, %c0_i32_0 : i32, i32
  }
  func.func @transform_3(%arg0: i32, %arg1: i32) -> (i32, i32) {
    %c0_i32 = arith.constant 0 : i32
    %c0_i32_0 = arith.constant 0 : i32
    %c0_i32_1 = arith.constant 0 : i32
    return %c0_i32, %c0_i32_0 : i32, i32
  }
  func.func @transform_4(%arg0: i32, %arg1: i32) -> (i32, i32) {
    %c0_i32 = arith.constant 0 : i32
    %c0_i32_0 = arith.constant 0 : i32
    %c0_i32_1 = arith.constant 0 : i32
    return %c0_i32, %c0_i32_0 : i32, i32
  }
  func.func @transform_5(%arg0: i32, %arg1: i32) -> (i32, i32) {
    %c0_i32 = arith.constant 0 : i32
    %c0_i32_0 = arith.constant 0 : i32
    %c0_i32_1 = arith.constant 0 : i32
    return %c0_i32, %c0_i32_0 : i32, i32
  }
  func.func @transform_6(%arg0: i32, %arg1: i32) -> (i32, i32) {
    %c0_i32 = arith.constant 0 : i32
    %c0_i32_0 = arith.constant 0 : i32
    %c0_i32_1 = arith.constant 0 : i32
    return %c0_i32, %c0_i32_0 : i32, i32
  }
  func.func @transform_7(%arg0: i32, %arg1: i32) -> (i32, i32) {
    %c0_i32 = arith.constant 0 : i32
    %c0_i32_0 = arith.constant 0 : i32
    %c0_i32_1 = arith.constant 0 : i32
    return %c0_i32, %c0_i32_0 : i32, i32
  }
  func.func @transform_8(%arg0: i32, %arg1: i32) -> (i32, i32) {
    %c0_i32 = arith.constant 0 : i32
    %c0_i32_0 = arith.constant 0 : i32
    %c0_i32_1 = arith.constant 0 : i32
    return %c0_i32, %c0_i32_0 : i32, i32
  }
  func.func @transform_9(%arg0: i32, %arg1: i32) -> (i32, i32) {
    %c0_i32 = arith.constant 0 : i32
    %c0_i32_0 = arith.constant 0 : i32
    return %arg1, %c0_i32 : i32, i32
  }
  func.func @transform_10(%arg0: i32, %arg1: i32) -> (i32, i32) {
    %c0_i32 = arith.constant 0 : i32
    %c0_i32_0 = arith.constant 0 : i32
    return %c0_i32, %arg1 : i32, i32
  }
  func.func @transform_11(%arg0: i32, %arg1: i32) -> (i32, i32) {
    %c0_i32 = arith.constant 0 : i32
    %c0_i32_0 = arith.constant 0 : i32
    return %arg0, %c0_i32 : i32, i32
  }
  func.func @transform_12(%arg0: i32, %arg1: i32) -> (i32, i32) {
    %c0_i32 = arith.constant 0 : i32
    %c0_i32_0 = arith.constant 0 : i32
    return %arg0, %c0_i32 : i32, i32
  }
}

</mosaic_0001>

<bundles_post_ra>
// kernel: tpu_custom_call.1
= control target key start
LH: loop header
LB: loop body
LE: loop exit
PB: predicated region body
PF: predicated region fallthrough
CT: control target
= control target key end

     0   :  { %18 = vsyncpa [#allocation6], 0  ;;  %s1048_s0 = inlined_call_operand.hbm [shape: f32[8,28], index: 0, kind: input, shape index: {}]   ;;  %s1049_s1 = inlined_call_operand.hbm [shape: bf16[28,32], index: 1, kind: input, shape index: {}]   ;;  %s1050_s2 = inlined_call_operand.vmem [shape: f32[1,32], index: 2, kind: input, shape index: {}]   ;;  %s1051_s3 = inlined_call_operand.hbm [shape: bf16[32,32], index: 3, kind: input, shape index: {}]   ;;  %s1052_s4 = inlined_call_operand.vmem [shape: f32[1,32], index: 4, kind: input, shape index: {}]   ;;  %s1053_s5 = inlined_call_operand.vmem [shape: bf16[32,32], index: 5, kind: input, shape index: {}]   ;;  %s1054_s6 = inlined_call_operand.vmem [shape: f32[1,32], index: 6, kind: input, shape index: {}]   ;;  %s1055_s7 = inlined_call_operand.hbm [shape: bf16[32,128], index: 7, kind: input, shape index: {}]   ;;  %s1056_s8 = inlined_call_operand.vmem [shape: f32[1,128], index: 8, kind: input, shape index: {}]   ;;  %s1057_s9 = inlined_call_operand.hbm [shape: f32[128,128], index: 9, kind: input, shape index: {}]   ;;  %s1058_s10 = inlined_call_operand.vmem [shape: f32[1,128], index: 10, kind: input, shape index: {}]   ;;  %s1059_s11 = inlined_call_operand.hbm [shape: f32[8,128], index: 11, kind: output, shape index: {0}]   ;;  %s1060_s12 = inlined_call_operand.vmem [shape: s32[8,1], index: 12, kind: output, shape index: {1}]  }
   0x1   :  { %19 = vsyncpa [#allocation9], 0 }
   0x2   :  { %20 = vsyncpa [#allocation12], 0 }
   0x3   :  { %21 = vsyncpa [#allocation7], 0  ;;  %s848_s21 = smov [#allocation8]   ;;  %s708_s25 = scalar_lea.hbm %s1049_s1, 256 }
   0x4   :  { %s37_s22 = sshll.u32 %s848_s21, 4  ;;  %p709_p0 = scmp.ne.s32.totalorder %s1049_s1, %s708_s25  ;;  %s38_s22 = int_to_ptr.vmem [resolvable:$true] %s37_s22 }
   0x5   :  { %p712_p1 = scmp.lt.u32.totalorder %s708_s25, %s1049_s1 }
   0x7   :  { %p714_p2 = pnand %p712_p1, %p709_p0 }
   0x9   :  { %717 = shalt.err (!%p714_p2)
}
   0xa   :  { %s718_s30 = scalar_lea.vmem %s38_s22, 256  ;;  %p723_p4 = scmp.lt.s32.totalorder %s38_s22, %s38_s22 }
   0xb   :  { %p719_p3 = scmp.ne.s32.totalorder %s38_s22, %s718_s30  ;;  %p724_p5 = scmp.lt.s32.totalorder %s718_s30, %s718_s30 }
   0xd   :  { %p725_p6 = por %p724_p5, %p723_p4 }
   0xf   :  { %p726_p7 = pnand %p725_p6, %p719_p3 }
  0x11   :  { %729 = shalt.err (!%p726_p7)
}
  0x12   :  { %s849_s13 = smov 64   ;;  %s850_s14 = smov 4  }
  0x13   :  { %43 = dma.hbm_to_vmem [thread:$0]  %s1049_s1, 256, %s38_s22, [#allocation9], %s849_s13, %s849_s13, %s850_s14  }
  0x14   :  { %s851_s17 = smov [#allocation11]   ;;  %s852_s19 = smov [#allocation5]  }
  0x15   :  { %s69_s18 = sshll.u32 %s851_s17, 4  ;;  %s28_s20 = sshll.u32 %s852_s19, 4  ;;  %s70_s18 = int_to_ptr.vmem [resolvable:$true] %s69_s18  ;;  %s29_s20 = int_to_ptr.vmem [resolvable:$true] %s28_s20 }
  0x16   :  { %s730_s24 = scalar_lea.hbm %s1055_s7, 256 }
  0x17   :  { %p731_p8 = scmp.ne.s32.totalorder %s1055_s7, %s730_s24  ;;  %p734_p9 = scmp.lt.u32.totalorder %s730_s24, %s1055_s7 }
  0x19   :  { %p736_p10 = pnand %p734_p9, %p731_p8 }
  0x1b   :  { %739 = shalt.err (!%p736_p10)
}
  0x1c   :  { %s740_s1 = scalar_lea.vmem %s70_s18, 256  ;;  %p745_p12 = scmp.lt.s32.totalorder %s70_s18, %s70_s18 }
  0x1d   :  { %p741_p11 = scmp.ne.s32.totalorder %s70_s18, %s740_s1  ;;  %p746_p13 = scmp.lt.s32.totalorder %s740_s1, %s740_s1 }
  0x1f   :  { %p747_p0 = por %p746_p13, %p745_p12 }
  0x21   :  { %p748_p1 = pnand %p747_p0, %p741_p11 }
  0x23   :  { %751 = shalt.err (!%p748_p1)
}
  0x24   :  { %75 = dma.hbm_to_vmem [thread:$0]  %s1055_s7, 256, %s70_s18, [#allocation12], %s849_s13, %s849_s13, %s850_s14  }
  0x25   :  { %s752_s16 = scalar_lea.hbm %s1048_s0, 128 }
  0x26   :  { %p753_p2 = scmp.ne.s32.totalorder %s1048_s0, %s752_s16  ;;  %p756_p3 = scmp.lt.u32.totalorder %s752_s16, %s1048_s0 }
  0x28   :  { %p758_p4 = pnand %p756_p3, %p753_p2 }
  0x2a   :  { %761 = shalt.err (!%p758_p4)
}
  0x2b   :  { %s762_s24 = scalar_lea.vmem %s29_s20, 128  ;;  %p767_p6 = scmp.lt.s32.totalorder %s29_s20, %s29_s20 }
  0x2c   :  { %p763_p5 = scmp.ne.s32.totalorder %s29_s20, %s762_s24  ;;  %p768_p7 = scmp.lt.s32.totalorder %s762_s24, %s762_s24 }
  0x2e   :  { %p769_p8 = por %p768_p7, %p767_p6 }
  0x30   :  { %p770_p9 = pnand %p769_p8, %p763_p5 }
  0x32   :  { %773 = shalt.err (!%p770_p9)
}
  0x33   :  { %31 = dma.hbm_to_vmem [thread:$0]  %s1048_s0, 128, %s29_s20, [#allocation6]  }
  0x34   :  { %s853_s25 = smov [#allocation10]   ;;  %s854_s27 = smov [#allocation13]  }
  0x35   :  { %s51_s26 = sshll.u32 %s853_s25, 4  ;;  %s83_s28 = sshll.u32 %s854_s27, 4  ;;  %s52_s26 = int_to_ptr.vmem [resolvable:$true] %s51_s26  ;;  %s84_s28 = int_to_ptr.vmem [resolvable:$true] %s83_s28 }
  0x36   :  { %s774_s29 = scalar_lea.hbm %s1051_s3, 256 }
  0x37   :  { %p775_p10 = scmp.ne.s32.totalorder %s1051_s3, %s774_s29  ;;  %p778_p11 = scmp.lt.u32.totalorder %s774_s29, %s1051_s3 }
  0x39   :  { %p780_p12 = pnand %p778_p11, %p775_p10 }
  0x3b   :  { %783 = shalt.err (!%p780_p12)
}
  0x3c   :  { %s784_s0 = scalar_lea.vmem %s52_s26, 256  ;;  %p789_p0 = scmp.lt.s32.totalorder %s52_s26, %s52_s26 }
  0x3d   :  { %p785_p13 = scmp.ne.s32.totalorder %s52_s26, %s784_s0  ;;  %p790_p1 = scmp.lt.s32.totalorder %s784_s0, %s784_s0 }
  0x3f   :  { %p791_p2 = por %p790_p1, %p789_p0 }
  0x41   :  { %p792_p3 = pnand %p791_p2, %p785_p13 }
  0x43   :  { %795 = shalt.err (!%p792_p3)
}
  0x44   :  { %57 = dma.hbm_to_vmem [thread:$0]  %s1051_s3, 256, %s52_s26, [#allocation9], %s849_s13, %s849_s13, %s850_s14  }
  0x45   :  { %s796_s24 = scalar_lea.hbm %s1057_s9, 2048 }
  0x46   :  { %p797_p4 = scmp.ne.s32.totalorder %s1057_s9, %s796_s24  ;;  %p800_p5 = scmp.lt.u32.totalorder %s796_s24, %s1057_s9 }
  0x48   :  { %p802_p6 = pnand %p800_p5, %p797_p4 }
  0x4a   :  { %805 = shalt.err (!%p802_p6)
}
  0x4b   :  { %s806_s1 = scalar_lea.vmem %s84_s28, 2048  ;;  %p811_p8 = scmp.lt.s32.totalorder %s84_s28, %s84_s28 }
  0x4c   :  { %p807_p7 = scmp.ne.s32.totalorder %s84_s28, %s806_s1  ;;  %p812_p9 = scmp.lt.s32.totalorder %s806_s1, %s806_s1 }
  0x4e   :  { %p813_p10 = por %p812_p9, %p811_p8 }
  0x50   :  { %p814_p11 = pnand %p813_p10, %p807_p7 }
  0x52   :  { %817 = shalt.err (!%p814_p11)
}
  0x53   :  { %s855_s3 = smov 128   ;;  %s856_s13 = smov 8  }
  0x54   :  { %89 = dma.hbm_to_vmem [thread:$0]  %s1057_s9, 2048, %s84_s28, [#allocation12], %s855_s3, %s855_s3, %s856_s13  }
  0x55   :  { %840 = dma.done.wait [#allocation6], 128  }
  0x56   :  { %841 = vsyncadd [#allocation6], 4294967168 }
  0x57   :  { %842 = dma.done.wait [#allocation9], 512  }
  0x58   :  { %843 = vsyncadd [#allocation9], 4294966784 }
  0x59   :  { %844 = dma.done.wait [#allocation12], 2304  }
  0x5a   :  { %845 = vsyncadd [#allocation12], 4294964992  ;;  %v857_v0 = vmov 0.0   ;;  %vm858_vm0 = vmmov 0   ;;  %v700_v1 = vld [vmem:[#allocation8] sm:$0xff]   ;;  %vm140_vm1 = vcmask 1045504  }
  0x5b   :  { %594 = vmatprep.subr.bf16.mxu1 %v857_v0  ;;  %598 = vmatprep.mubr.msk.bf16.mxu1 %vm858_vm0, %v857_v0  ;;  %v701_v2 = vld [vmem:[#allocation8 + $0x8] sm:$0x3f]   ;;  %v112_v3 = vld [vmem:[#allocation5] sm:$0xff]  ;;  %vm136_vm2 = vcmask 228352   ;;  %v702_v5 = vld [vmem:[#allocation10] sm:$0xff]   ;;  %vm209_vm3 = vcmask 261120  }
  0x5c   :  { %658 = vmatprep.mubr.msk.f32.mxu0 %vm858_vm0, %v857_v0  ;;  %595 = vmatpush3.bf16.msra.mxu1 %v700_v1  ;;  %v142_v4 = vsel %vm140_vm1, %v701_v2, 0  ;;  %v113_v6 = vpack.c.bf16 %v112_v3, %v112_v3  ;;  %v703_v7 = vld [vmem:[#allocation10 + $0x8] sm:$0xff]   ;;  %v705_v17 = vld [vmem:[%s1053_s5 + $0x8] sm:$0xff]   ;;  %v707_v27 = vld [vmem:[#allocation11 + $0x8] sm:$0xff]   ;;  %v859_v30 = vmov 0.0|0.0   ;;  %vm391_vm4 = vcmask 7168  }
  0x5d   :  { %596 = vmatprep.subr.bf16.mxu1 %v857_v0  ;;  %v548_v8 = vld [vmem:[%s1050_s2] ss:$0 sm:$0xff]  ;;  %v706_v25 = vld [vmem:[#allocation11] sm:$0xff]   ;;  %v395_v28 = vld [vmem:[#allocation13] sm:$0xff]  ;;  %661 = vmatprep.subr.bf16.mxu0 %v859_v30  ;;  %v860_v3 = vmov inf  }
  0x5e   :  { %v704_v15 = vld [vmem:[%s1053_s5] sm:$0xff]   ;;  %v397_v32 = vld [vmem:[#allocation13 + $0x10] sm:$0xff]  ;;  %v398_v33 = vld [vmem:[#allocation13 + $0x18] sm:$0xff]  ;;  %392 = vst.msk [vmem:[#allocation3] sm:$0xff] %vm391_vm4, %v860_v3 }
  0x5f   :  { %v552_v18 = vld [vmem:[%s1052_s4] ss:$0 sm:$0xff]  ;;  %v665_v34 = vpack.c.bf16 %v398_v33, %v397_v32  ;;  %v399_v35 = vld [vmem:[#allocation13 + $0x20] sm:$0xff]  ;;  %v401_v38 = vld [vmem:[#allocation13 + $0x30] sm:$0xff] }
  0x60   :  { %597 = vmatpush3.bf16.msra.mxu1 %v142_v4  ;;  %v396_v29 = vld [vmem:[#allocation13 + $0x8] sm:$0xff]  ;;  %v402_v39 = vld [vmem:[#allocation13 + $0x38] sm:$0xff]  ;;  %v403_v41 = vld [vmem:[#allocation13 + $0x40] sm:$0xff] }
  0x61   :  { %602 = vmatprep.subr.bf16.mxu1 %v857_v0  ;;  %v662_v31 = vpack.c.bf16 %v396_v29, %v395_v28  ;;  %v400_v36 = vld [vmem:[#allocation13 + $0x28] sm:$0xff]  ;;  %v671_v40 = vpack.c.bf16 %v402_v39, %v401_v38  ;;  %v405_v44 = vld [vmem:[#allocation13 + $0x50] sm:$0xff]  ;;  %v406_v45 = vld [vmem:[#allocation13 + $0x58] sm:$0xff] }
  0x62   :  { %v668_v37 = vpack.c.bf16 %v400_v36, %v399_v35  ;;  %v404_v42 = vld [vmem:[#allocation13 + $0x48] sm:$0xff]  ;;  %v677_v46 = vpack.c.bf16 %v406_v45, %v405_v44  ;;  %v407_v47 = vld [vmem:[#allocation13 + $0x60] sm:$0xff]  ;;  %v409_v50 = vld [vmem:[#allocation13 + $0x70] sm:$0xff] }
  0x63   :  { %599 = vmatmul.mubr.msk.bf16.vlgmr.msra.gmra.mrb[0].mxu1 %vm136_vm2, %v113_v6  ;;  %663 = vmatpush3.bf16.xpose.msra.mxu0 %v662_v31  ;;  %v674_v43 = vpack.c.bf16 %v404_v42, %v403_v41  ;;  %v408_v48 = vld [vmem:[#allocation13 + $0x68] sm:$0xff]  ;;  %v410_v51 = vld [vmem:[#allocation13 + $0x78] sm:$0xff] }
  0x64   :  { %603 = vmatpush3.bf16.msra.mxu1 %v702_v5  ;;  %606 = vmatprep.mubr.msk.bf16.mxu1 %vm858_vm0, %v857_v0  ;;  %v680_v49 = vpack.c.bf16 %v408_v48, %v407_v47  ;;  %v683_v52 = vpack.c.bf16 %v410_v51, %v409_v50  ;;  %v556_v53 = vld [vmem:[%s1054_s6] ss:$0 sm:$0xff] }
  0x65   :  { %604 = vmatprep.subr.bf16.mxu1 %v857_v0  ;;  %664 = vmatprep.subr.bf16.mxu0 %v859_v30  ;;  %v560_v61 = vld [vmem:[%s1056_s8] ss:$0 sm:$0xff]  ;;  %s862_s8 = smov [#allocation14]  }
  0x66   :  { %v564_v5 = vld [vmem:[%s1058_s10] ss:$0 sm:$0xff]  ;;  %s533_s10 = sshll.u32 %s862_s8, 4  ;;  %s534_s10 = int_to_ptr.vmem [resolvable:$true] %s533_s10 }
  0x67   :  { %s818_s19 = scalar_lea.vmem %s534_s10, 128  ;;  %p823_p13 = scmp.lt.s32.totalorder %s534_s10, %s534_s10 }
  0x68   :  { %605 = vmatpush3.bf16.msra.mxu1 %v703_v7  ;;  %p819_p12 = scmp.ne.s32.totalorder %s534_s10, %s818_s19  ;;  %p824_p0 = scmp.lt.s32.totalorder %s818_s19, %s818_s19 }
  0x69   :  { %610 = vmatprep.subr.bf16.mxu1 %v857_v0 }
  0x6a   :  { %p825_p1 = por %p824_p0, %p823_p13 }
  0x6b   :  { %666 = vmatpush3.bf16.xpose.msra.mxu0 %v665_v34 }
  0x6c   :  { %667 = vmatprep.subr.bf16.mxu0 %v859_v30  ;;  %p826_p2 = pnand %p825_p1, %p819_p12 }
  0x73   :  { %669 = vmatpush3.bf16.xpose.msra.mxu0 %v668_v37 }
  0x74   :  { %670 = vmatprep.subr.bf16.mxu0 %v859_v30 }
  0x7b   :  { %672 = vmatpush3.bf16.xpose.msra.mxu0 %v671_v40 }
  0x7c   :  { %673 = vmatprep.subr.bf16.mxu0 %v859_v30 }
  0x83   :  { %675 = vmatpush3.bf16.xpose.msra.mxu0 %v674_v43 }
  0x84   :  { %676 = vmatprep.subr.bf16.mxu0 %v859_v30 }
  0x8b   :  { %678 = vmatpush3.bf16.xpose.msra.mxu0 %v677_v46 }
  0x8c   :  { %679 = vmatprep.subr.bf16.mxu0 %v859_v30 }
  0x93   :  { %681 = vmatpush3.bf16.xpose.msra.mxu0 %v680_v49 }
  0x94   :  { %682 = vmatprep.subr.bf16.mxu0 %v859_v30 }
  0x9b   :  { %684 = vmatpush3.bf16.xpose.msra.mxu0 %v683_v52 }
 0x136   :  { %v178_v9 = vpop.f32.mrb[0].mxu1 }
 0x137   :  { %v179_v10 = vadd.f32 %v548_v8, %v178_v9  ;;  %v600_v11 = vpop.f32.mrb[1].mxu1  ;;  %v491_v9 = vlaneseq }
 0x138   :  { %v181_v12 = vpop.f32.mrb[2].mxu1 }
 0x139   :  { %v184_v13 = vmax.f32 %v179_v10, 0.0  ;;  %v601_v14 = vpop.f32.mrb[3].mxu1  ;;  %v513_v10 = vld [vmem:[#allocation3] sm:$0xff]  ;;  %v492_v11 = vand.u32 127, %v491_v9 }
 0x13b   :  { %v185_v16 = vpack.c.bf16 %v184_v13, %v184_v13 }
 0x13d   :  { %607 = vmatmul.mubr.msk.bf16.vlgmr.msra.gmra.mrb[4].mxu1 %vm209_vm3, %v185_v16 }
 0x13e   :  { %611 = vmatpush3.bf16.msra.mxu1 %v704_v15  ;;  %614 = vmatprep.mubr.msk.bf16.mxu1 %vm858_vm0, %v857_v0 }
 0x13f   :  { %612 = vmatprep.subr.bf16.mxu1 %v857_v0 }
 0x142   :  { %613 = vmatpush3.bf16.msra.mxu1 %v705_v17  ;;  %v861_v17 = vmov 0  }
 0x143   :  { %618 = vmatprep.subr.bf16.mxu1 %v857_v0  ;;  %393 = vst.msk [vmem:[#allocation4] sm:$0xff] %vm391_vm4, %v861_v17 }
 0x210   :  { %v247_v19 = vpop.f32.mrb[4].mxu1 }
 0x211   :  { %v248_v20 = vadd.f32 %v552_v18, %v247_v19  ;;  %v608_v21 = vpop.f32.mrb[5].mxu1 }
 0x212   :  { %v250_v22 = vpop.f32.mrb[6].mxu1 }
 0x213   :  { %v253_v23 = vmax.f32 %v248_v20, 0.0  ;;  %v609_v24 = vpop.f32.mrb[7].mxu1 }
 0x215   :  { %v254_v26 = vpack.c.bf16 %v253_v23, %v253_v23 }
 0x217   :  { %615 = vmatmul.mubr.msk.bf16.vlgmr.msra.gmra.mrb[8].mxu1 %vm209_vm3, %v254_v26 }
 0x218   :  { %619 = vmatpush3.bf16.msra.mxu1 %v706_v25  ;;  %622 = vmatprep.mubr.msk.bf16.mxu1 %vm858_vm0, %v857_v0 }
 0x219   :  { %620 = vmatprep.subr.bf16.mxu1 %v857_v0 }
 0x21c   :  { %621 = vmatpush3.bf16.msra.mxu1 %v707_v27 }
 0x2ea   :  { %v315_v54 = vpop.f32.mrb[8].mxu1 }
 0x2eb   :  { %v316_v55 = vadd.f32 %v556_v53, %v315_v54  ;;  %v616_v56 = vpop.f32.mrb[9].mxu1 }
 0x2ec   :  { %v318_v57 = vpop.f32.mrb[10].mxu1 }
 0x2ed   :  { %v321_v58 = vmax.f32 %v316_v55, 0.0  ;;  %v617_v59 = vpop.f32.mrb[11].mxu1 }
 0x2ef   :  { %v322_v60 = vpack.c.bf16 %v321_v58, %v321_v58 }
 0x2f1   :  { %623 = vmatmul.mubr.msk.bf16.vlgmr.msra.gmra.mrb[12].mxu1 %vm209_vm3, %v322_v60 }
 0x3c4   :  { %v383_v62 = vpop.f32.mrb[12].mxu1 }
 0x3c5   :  { %v384_v63 = vadd.f32 %v560_v61, %v383_v62  ;;  %v624_v0 = vpop.f32.mrb[13].mxu1 }
 0x3c6   :  { %v386_v1 = vpop.f32.mrb[14].mxu1 }
 0x3c7   :  { %390 = vst [vmem:[#allocation14] sm:$0xff] %v384_v63  ;;  %v625_v2 = vpop.f32.mrb[15].mxu1  ;;  %659 = vmatmul.mubr.f32.vlgmr.msra.gmra.mrb[0].mxu0 %v384_v63 }
 0x49a   :  { %v477_v4 = vpop.f32.mrb[0].mxu0 }
 0x49b   :  { %v482_v6 = vmul.f32 2.0, %v477_v4  ;;  %v660_v7 = vpop.f32.mrb[1].mxu0 }
 0x49d   :  { %v489_v8 = vsub.f32 %v564_v5, %v482_v6 }
 0x49f   :  { %495 = vmin.xlane.f32.xlu0 %v489_v8 }
 0x52c   :  { %v496_v12 = vpop.xlane.xlu0 %495 }
 0x52d   :  { %vm497_vm5 = vcmp.le.f32.partialorder %v489_v8, %v496_v12  ;;  %vm514_vm6 = vcmp.lt.f32.partialorder %v496_v12, %v513_v10 }
 0x52e   :  { %v520_v13 = vsel %vm514_vm6, %v496_v12, %v513_v10  ;;  %v498_v14 = vsel %vm497_vm5, %v492_v11, 1073741824 }
 0x52f   :  { %521 = vst.msk [vmem:[#allocation3] sm:$0xff] %vm391_vm4, %v520_v13  ;;  %v500_v15 = vshra.s32 %v498_v14, 16  ;;  %v499_v18 = vand.u32 65535, %v498_v14 }
 0x531   :  { %v502_v16 = vcvt.s32.f32 %v500_v15  ;;  %v501_v20 = vcvt.s32.f32 %v499_v18 }
 0x533   :  { %503 = vmin.xlane.f32.xlu0 %v502_v16 }
 0x5c0   :  { %v504_v19 = vpop.xlane.xlu0 %503 }
 0x5c1   :  { %vm505_vm7 = vcmp.eq.f32.partialorder %v502_v16, %v504_v19 }
 0x5c2   :  { %v506_v21 = vsel %vm505_vm7, %v501_v20, inf }
 0x5c3   :  { %507 = vmin.xlane.f32.xlu1 %v506_v21 }
 0x5c4   :  { %829 = shalt.err (!%p826_p2)
}
 0x5c5   :  { %s830_s24 = scalar_lea.hbm %s1059_s11, 128 }
 0x5c6   :  { %p831_p3 = scmp.ne.s32.totalorder %s1059_s11, %s830_s24  ;;  %p834_p4 = scmp.lt.u32.totalorder %s830_s24, %s1059_s11 }
 0x5c8   :  { %p836_p5 = pnand %p834_p4, %p831_p3 }
 0x5ca   :  { %839 = shalt.err (!%p836_p5)
}
 0x5cb   :  { %536 = dma.vmem_to_hbm [thread:$0]  %s534_s10, 128, %s1059_s11, [#allocation7]   ;;  %v510_v22 = vcvt.f32.s32 %v504_v19  ;;  %v515_v26 = vld [vmem:[#allocation4] sm:$0xff] }
 0x5cd   :  { %v511_v24 = vshll.u32 %v510_v22, 16 }
 0x650   :  { %v508_v23 = vpop.xlane.xlu1 %507 }
 0x651   :  { %v509_v25 = vcvt.f32.s32 %v508_v23 }
 0x653   :  { %v512_v27 = vadd.s32 %v511_v24, %v509_v25 }
 0x655   :  { %v516_v28 = vsel %vm514_vm6, %v512_v27, %v515_v26 }
 0x656   :  { %518 = vst.msk [vmem:[#allocation4] sm:$0xff] %vm391_vm4, %v516_v28 }
 0x65d   :  { %v525_v29 = vld [vmem:[#allocation4] sm:$0xff] }
 0x65e   :  { %526 = vst.msk [vmem:[%s1060_s12] sm:$0xff] %vm391_vm4, %v525_v29 }
 0x65f   :  { %846 = dma.done.wait [#allocation7], 128  }
 0x660   :  { %847 = vsyncadd [#allocation7], 4294967168 }
 0x661   :  { %544 = vsyncpa [#allocation6], 1 }
 0x662   :  { %545 = vsyncpa [#allocation9], 1 }
 0x663   :  { %546 = vsyncpa [#allocation12], 1 }
 0x664   :  { %547 = vsyncpa [#allocation7], 1 }

</bundles_post_ra>
